<compile_context>
chip_gen: v5e
topology: v5e:2x2
jax: 0.10.0
libtpu: 0.0.40
codegen_flags: <defaults>
</compile_context>

<pallas_src>
import functools

import jax
import jax.numpy as jnp
from jax import lax
from jax.experimental import pallas as pl
from jax.experimental.pallas import tpu as pltpu


def _round_up(x, m):
    return ((x + m - 1) // m) * m


def textrnn_kernel(ids_ref, h0_ref, wih_ref, whh_ref, w_ref, out_ref):
    """Whole TextRNN forward in one kernel invocation (no VMEM scratch).

    ids_ref : [S*Bp, Vp] int32  token ids, time-major, lane-broadcast
    h0_ref  : [Bp, Hp]   f32    initial hidden state (zero-padded)
    wih_ref : [Vp, Hp]   bf16   input->hidden weights^T; row Vp-1 = b_ih + b_hh
    whh_ref : [Hp, Hp]   bf16   hidden->hidden weights^T
    w_ref   : [Hp, Vp]   bf16   output projection;       row Hp-1 = b
    out_ref : [Bp, Vp]   f32    logits (lane-dense)
    """
    SBp, Vp = ids_ref.shape
    Bp, Hp = h0_ref.shape
    S = SBp // Bp                      # static trip count

    # --- One-hot (+ constant-1 "bias lane" at Vp-1) built in-register -------
    ids = ids_ref[...]
    iota_v = lax.broadcasted_iota(jnp.int32, (SBp, Vp), 1)
    onehot = jnp.logical_or(iota_v == ids,
                            iota_v == Vp - 1).astype(jnp.bfloat16)

    # --- Hoisted input projection: ONE MXU matmul for all timesteps ---------
    # Row Vp-1 of wih carries (b_ih + b_hh), so the recurrence bias is folded
    # into this matmul.  The result stays in registers; no scratch buffer.
    x_proj = jnp.dot(onehot, wih_ref[...],
                     preferred_element_type=jnp.float32)      # [S*Bp, Hp] f32

    whh = whh_ref[...]                                        # [Hp, Hp] bf16
    h = h0_ref[...]                                           # [Bp, Hp] f32

    # S is tiny & static -> plain Python unroll with static slices of x_proj.
    # TODO(synk): for long sequences keep W_hh stationary in the MXU via
    # pltpu.matmul_push_rhs / matmul_acc_lhs / matmul_pop instead of jnp.dot.
    for t in range(S):
        xp_t = x_proj[t * Bp:(t + 1) * Bp, :]                 # static slice
        h = jnp.tanh(xp_t + jnp.dot(h.astype(jnp.bfloat16), whh,
                                    preferred_element_type=jnp.float32))

    # --- Final projection; output bias folded into row Hp-1 of w_ref --------
    # Padded hidden columns of h are exactly zero, so lane Hp-1 is free to
    # hold the constant 1 that selects the bias row of w_ref.
    iota_h = lax.broadcasted_iota(jnp.int32, (Bp, Hp), 1)
    h_aug = jnp.where(iota_h == Hp - 1, 1.0, h)
    out_ref[...] = jnp.dot(h_aug.astype(jnp.bfloat16), w_ref[...],
                           preferred_element_type=jnp.float32)


def prepare_textrnn_params(w_ih, w_hh, b_ih, b_hh, W, b):
    """One-time pad / transpose / bf16-cast of the weights (hoisted out of the
    per-call forward).  PyTorch layout: w_ih [H,V], w_hh [H,H], W [H,V], b [V].

    The last lane of the padded vocab axis holds the folded RNN bias row and
    the last lane of the padded hidden axis holds the folded output bias row.
    """
    H, V = w_ih.shape
    Hp = _round_up(H + 1, 128)      # +1: lane Hp-1 reserved for output bias
    Vp = _round_up(V + 1, 128)      # +1: lane Vp-1 reserved for RNN bias
    f32 = jnp.float32

    wih_p = (jnp.zeros((Vp, Hp), f32)
             .at[:V, :H].set(w_ih.T)
             .at[Vp - 1, :H].set(b_ih + b_hh)
             .astype(jnp.bfloat16))
    whh_p = jnp.zeros((Hp, Hp), f32).at[:H, :H].set(w_hh.T).astype(jnp.bfloat16)
    w_p = (jnp.zeros((Hp, Vp), f32)
           .at[:H, :V].set(W)
           .at[Hp - 1, :V].set(b)
           .astype(jnp.bfloat16))
    return wih_p, whh_p, w_p


@functools.partial(jax.jit, static_argnames=("vocab_size",))
def textrnn_forward(word_idx, h0, wih_p, whh_p, w_p, *, vocab_size):
    """word_idx: [B, S] int token ids; h0: [B, H] f32.  Returns logits [B, V]."""
    B, S = word_idx.shape
    H = h0.shape[1]
    Vp, Hp = wih_p.shape
    Bp = _round_up(B, 8)            # sublane-dense batch
    f32 = jnp.float32

    # Time-major ids; padded batch rows reuse id 0 (their outputs are computed
    # and then discarded by the [:B] slice below).  Pre-broadcast along lanes
    # so the in-kernel one-hot build is a dense VPU compare.
    # TODO(synk): for real vocab sizes pass ids via SMEM / scalar prefetch
    # instead of a [S*Bp, Vp] lane-broadcast array.
    ids_tm = jnp.zeros((S, Bp), jnp.int32).at[:, :B].set(
        word_idx.T.astype(jnp.int32))
    ids = jnp.broadcast_to(ids_tm.reshape(S * Bp, 1), (S * Bp, Vp))

    h0_p = jnp.zeros((Bp, Hp), f32).at[:B, :H].set(h0)

    vmem = pl.BlockSpec(memory_space=pltpu.MemorySpace.VMEM)
    out_p = pl.pallas_call(
        textrnn_kernel,
        out_shape=jax.ShapeDtypeStruct((Bp, Vp), f32),
        in_specs=[vmem] * 5,
        out_specs=vmem,
    )(ids, h0_p, wih_p, whh_p, w_p)

    return out_p[:B, :vocab_size]


def textrnn_ref(x_onehot, h0, w_ih, w_hh, b_ih, b_hh, W, b,
                matmul_cast=lambda a: a, bias_cast=lambda a: a):
    """Pure-JAX reference mirroring torch.nn.RNN (tanh) + final mm.

    `matmul_cast` / `bias_cast` let us mirror the kernel's bf16 matmul
    operands and bf16-folded biases for a tight numerical comparison.
    """
    x_tm = jnp.transpose(x_onehot, (1, 0, 2))         # X.transpose(0, 1)
    rnn_bias = bias_cast(b_ih + b_hh)
    h = h0
    for t in range(x_tm.shape[0]):
        h = jnp.tanh(matmul_cast(x_tm[t]) @ matmul_cast(w_ih.T) + rnn_bias
                     + matmul_cast(h) @ matmul_cast(w_hh.T))
    return matmul_cast(h) @ matmul_cast(W) + bias_cast(b)


if __name__ == "__main__":
    # Shapes implied by the original script:
    #   3 sentences of 3 words -> seq_len = 2 input words, batch = 3
    #   vocab = 7 unique words, hidden_size = 5
    seq_len, batch, vocab, hidden = 2, 3, 7, 5

    key = jax.random.PRNGKey(0)
    k_idx, k_wih, k_whh, k_bih, k_bhh, k_W, k_b = jax.random.split(key, 7)

    # Deterministic token ids (batch-major [B, S], like the PyTorch batch);
    # the one-hot is only built for the pure-JAX reference.
    word_idx = jax.random.randint(k_idx, (batch, seq_len), 0, vocab)
    x_onehot = jax.nn.one_hot(word_idx, vocab, dtype=jnp.float32)   # [B, S, V]

    # hidden = zeros(1, batch, hidden) in the original; wrapper takes [B, H].
    h0 = jnp.zeros((batch, hidden), jnp.float32)

    # RNN parameters (PyTorch layout: weight_ih [H, V], weight_hh [H, H]).
    w_ih = jax.random.normal(k_wih, (hidden, vocab), jnp.float32)
    w_hh = jax.random.normal(k_whh, (hidden, hidden), jnp.float32)
    b_ih = jax.random.normal(k_bih, (hidden,), jnp.float32)
    b_hh = jax.random.normal(k_bhh, (hidden,), jnp.float32)

    # Output projection parameters (as in the module's __init__).
    W = jax.random.normal(k_W, (hidden, vocab), jnp.float32)
    b = jax.random.normal(k_b, (vocab,), jnp.float32)

    # One-time parameter prep (padding / transpose / bf16 cast), cached.
    wih_p, whh_p, w_p = prepare_textrnn_params(w_ih, w_hh, b_ih, b_hh, W, b)
    wih_p, whh_p, w_p = jax.block_until_ready((wih_p, whh_p, w_p))

    out = textrnn_forward(word_idx, h0, wih_p, whh_p, w_p, vocab_size=vocab)
    out = jax.block_until_ready(out)
    assert out.shape == (batch, vocab)

    # Tight (gating) check vs. a reference that mirrors the kernel's bf16
    # matmul operands and bf16-folded biases.
    def _bf(a):
        return a.astype(jnp.bfloat16).astype(jnp.float32)

    ref_bf16 = textrnn_ref(x_onehot, h0, w_ih, w_hh, b_ih, b_hh, W, b,
                           matmul_cast=_bf, bias_cast=_bf)
    assert jnp.allclose(out, ref_bf16, atol=1e-3, rtol=1e-3), \
        "mismatch vs bf16-mirrored reference"

    # Loose sanity check vs. the pure-f32 PyTorch-equivalent reference
    # (difference is only bf16 rounding of matmul operands / folded biases).
    ref_f32 = textrnn_ref(x_onehot, h0, w_ih, w_hh, b_ih, b_hh, W, b)
    assert jnp.allclose(out, ref_f32, atol=0.5), "gross mismatch vs f32 reference"

    print("KERNEL_OK")
</pallas_src>

<mosaic_0001>
module attributes {stable_mosaic.version = 11 : i64} {
  func.func @textrnn_kernel(%arg0: memref<16x128xi32, #tpu.memory_space<vmem>>, %arg1: memref<8x128xf32, #tpu.memory_space<vmem>>, %arg2: memref<128x128xbf16, #tpu.memory_space<vmem>>, %arg3: memref<128x128xbf16, #tpu.memory_space<vmem>>, %arg4: memref<128x128xbf16, #tpu.memory_space<vmem>>, %arg5: memref<8x128xf32, #tpu.memory_space<vmem>>) attributes {dimension_semantics = [], scalar_prefetch = 0 : i64, scratch_operands = 0 : i64, tpu.core_type = #tpu.core_type<tc>} {
    %c0 = arith.constant 0 : index
    %c0_0 = arith.constant 0 : index
    %0 = vector.load %arg0[%c0, %c0_0] : memref<16x128xi32, #tpu.memory_space<vmem>>, vector<16x128xi32>
    %1 = tpu.iota {dimensions = array<i32: 1>} : vector<16x128xi32>
    %2 = arith.cmpi eq, %1, %0 : vector<16x128xi32>
    %c127_i32 = arith.constant 127 : i32
    %3 = vector.broadcast %c127_i32 : i32 to vector<16x128xi32>
    %4 = arith.cmpi eq, %1, %3 : vector<16x128xi32>
    %5 = arith.ori %2, %4 : vector<16x128xi1>
    %6 = arith.extui %5 : vector<16x128xi1> to vector<16x128xi32>
    %7 = arith.sitofp %6 : vector<16x128xi32> to vector<16x128xf32>
    %8 = arith.truncf %7 : vector<16x128xf32> to vector<16x128xbf16>
    %c0_1 = arith.constant 0 : index
    %c0_2 = arith.constant 0 : index
    %9 = vector.load %arg2[%c0_1, %c0_2] : memref<128x128xbf16, #tpu.memory_space<vmem>>, vector<128x128xbf16>
    %cst = arith.constant dense<0.000000e+00> : vector<16x128xf32>
    %10 = tpu.matmul %8, %9, %cst {dimension_numbers = #tpu.dot_dimension_numbers<[1], [0], [0], [1], [0, 0, 1, 1], [], []>} : vector<16x128xbf16>, vector<128x128xbf16>, vector<16x128xf32> -> vector<16x128xf32>
    %c0_3 = arith.constant 0 : index
    %c0_4 = arith.constant 0 : index
    %11 = vector.load %arg3[%c0_3, %c0_4] : memref<128x128xbf16, #tpu.memory_space<vmem>>, vector<128x128xbf16>
    %c0_5 = arith.constant 0 : index
    %c0_6 = arith.constant 0 : index
    %12 = vector.load %arg1[%c0_5, %c0_6] : memref<8x128xf32, #tpu.memory_space<vmem>>, vector<8x128xf32>
    %13 = vector.extract_strided_slice %10 {offsets = [0, 0], sizes = [8, 128], strides = [1, 1]} : vector<16x128xf32> to vector<8x128xf32>
    %14 = arith.truncf %12 : vector<8x128xf32> to vector<8x128xbf16>
    %cst_7 = arith.constant dense<0.000000e+00> : vector<8x128xf32>
    %15 = tpu.matmul %14, %11, %cst_7 {dimension_numbers = #tpu.dot_dimension_numbers<[1], [0], [0], [1], [0, 0, 1, 1], [], []>} : vector<8x128xbf16>, vector<128x128xbf16>, vector<8x128xf32> -> vector<8x128xf32>
    %16 = arith.addf %13, %15 : vector<8x128xf32>
    %17 = math.tanh %16 : vector<8x128xf32>
    %18 = vector.extract_strided_slice %10 {offsets = [8, 0], sizes = [8, 128], strides = [1, 1]} : vector<16x128xf32> to vector<8x128xf32>
    %19 = arith.truncf %17 : vector<8x128xf32> to vector<8x128xbf16>
    %cst_8 = arith.constant dense<0.000000e+00> : vector<8x128xf32>
    %20 = tpu.matmul %19, %11, %cst_8 {dimension_numbers = #tpu.dot_dimension_numbers<[1], [0], [0], [1], [0, 0, 1, 1], [], []>} : vector<8x128xbf16>, vector<128x128xbf16>, vector<8x128xf32> -> vector<8x128xf32>
    %21 = arith.addf %18, %20 : vector<8x128xf32>
    %22 = math.tanh %21 : vector<8x128xf32>
    %23 = tpu.iota {dimensions = array<i32: 1>} : vector<8x128xi32>
    %c127_i32_9 = arith.constant 127 : i32
    %24 = vector.broadcast %c127_i32_9 : i32 to vector<8x128xi32>
    %25 = arith.cmpi eq, %23, %24 : vector<8x128xi32>
    %cst_10 = arith.constant 1.000000e+00 : f32
    %26 = vector.broadcast %cst_10 : f32 to vector<8x128xf32>
    %27 = arith.select %25, %26, %22 : vector<8x128xi1>, vector<8x128xf32>
    %28 = arith.truncf %27 : vector<8x128xf32> to vector<8x128xbf16>
    %c0_11 = arith.constant 0 : index
    %c0_12 = arith.constant 0 : index
    %29 = vector.load %arg4[%c0_11, %c0_12] : memref<128x128xbf16, #tpu.memory_space<vmem>>, vector<128x128xbf16>
    %cst_13 = arith.constant dense<0.000000e+00> : vector<8x128xf32>
    %30 = tpu.matmul %28, %29, %cst_13 {dimension_numbers = #tpu.dot_dimension_numbers<[1], [0], [0], [1], [0, 0, 1, 1], [], []>} : vector<8x128xbf16>, vector<128x128xbf16>, vector<8x128xf32> -> vector<8x128xf32>
    %c0_14 = arith.constant 0 : index
    %c0_15 = arith.constant 0 : index
    %31 = vector.load %arg5[%c0_14, %c0_15] : memref<8x128xf32, #tpu.memory_space<vmem>>, vector<8x128xf32>
    tpu.vector_store %arg5[%c0_14, %c0_15], %30 {strides = array<i32>} : memref<8x128xf32, #tpu.memory_space<vmem>>, vector<8x128xf32>,
    return
  }
}

</mosaic_0001>

<bundles_post_ra>
// kernel: textrnn_forward.1
= control target key start
LH: loop header
LB: loop body
LE: loop exit
PB: predicated region body
PF: predicated region fallthrough
CT: control target
= control target key end

     0   :  { %10 = vsyncpa [#allocation3], 0  ;;  %s612_s0 = inlined_call_operand.vmem [shape: s32[16,128], index: 0, kind: input, shape index: {}]   ;;  %s613_s1 = inlined_call_operand.vmem [shape: f32[8,128], index: 1, kind: input, shape index: {}]   ;;  %s614_s2 = inlined_call_operand.hbm [shape: bf16[128,128], index: 2, kind: input, shape index: {}]   ;;  %s615_s3 = inlined_call_operand.hbm [shape: bf16[128,128], index: 3, kind: input, shape index: {}]   ;;  %s616_s4 = inlined_call_operand.hbm [shape: bf16[128,128], index: 4, kind: input, shape index: {}]   ;;  %s617_s5 = inlined_call_operand.vmem [shape: f32[8,128], index: 5, kind: output, shape index: {}]  }
   0x1   :  { %11 = vsyncpa [#allocation5], 0  ;;  %s33_s20 = sshll.u32 %s615_s3, 4  ;;  %s552_s21 = smov [#allocation4]   ;;  %s34_s20 = int_to_ptr.hbm [resolvable:$true] %s33_s20 }
   0x2   :  { %s35_s22 = sshll.u32 %s552_s21, 4  ;;  %s20_s25 = sshll.u32 %s614_s2, 4  ;;  %s36_s22 = int_to_ptr.vmem [resolvable:$true] %s35_s22  ;;  %s21_s25 = int_to_ptr.hbm [resolvable:$true] %s20_s25 }
   0x3   :  { %s553_s26 = smov 64   ;;  %s554_s27 = smov 4  }
   0x4   :  { %41 = dma.hbm_to_vmem [thread:$0]  %s34_s20, 1024, %s36_s22, [#allocation5], %s553_s26, %s553_s26, %s554_s27  }
   0x5   :  { %s555_s28 = smov [#allocation2]   ;;  %s46_s7 = sshll.u32 %s616_s4, 4  ;;  %s47_s7 = int_to_ptr.hbm [resolvable:$true] %s46_s7 }
   0x6   :  { %s22_s29 = sshll.u32 %s555_s28, 4  ;;  %s556_s3 = smov [#allocation6]   ;;  %s23_s29 = int_to_ptr.vmem [resolvable:$true] %s22_s29 }
   0x7   :  { %28 = dma.hbm_to_vmem [thread:$0]  %s21_s25, 1024, %s23_s29, [#allocation3], %s553_s26, %s553_s26, %s554_s27  }
   0x8   :  { %s48_s8 = sshll.u32 %s556_s3, 4  ;;  %s49_s8 = int_to_ptr.vmem [resolvable:$true] %s48_s8 }
   0x9   :  { %54 = dma.hbm_to_vmem [thread:$0]  %s47_s7, 1024, %s49_s8, [#allocation5], %s553_s26, %s553_s26, %s554_s27  }
   0xa   :  { %548 = dma.done.wait [#allocation3], 1024  }
   0xb   :  { %549 = vsyncadd [#allocation3], 4294966272 }
   0xc   :  { %550 = dma.done.wait [#allocation5], 2048  }
   0xd   :  { %551 = vsyncadd [#allocation5], 4294965248  ;;  %v449_v0 = vld [vmem:[#allocation2 + $0x38] sm:$0xff]  ;;  %v448_v2 = vld [vmem:[#allocation2 + $0x30] sm:$0xff]  ;;  %v69_v10 = vlaneseq  ;;  %v557_v22 = vmov 1.0|1.0  }
   0xe   :  { %v457_v1 = vld [vmem:[#allocation4 + $0x38] sm:$0xff]  ;;  %145 = vmatpush.bf16.msra.mxu0 %v449_v0  ;;  %v456_v3 = vld [vmem:[#allocation4 + $0x30] sm:$0xff]  ;;  %v447_v4 = vld [vmem:[#allocation2 + $0x28] sm:$0xff] }
   0xf   :  { %225 = vmatpush.bf16.msra.mxu1 %v457_v1  ;;  %241 = vmatpush.bf16.msra.mxu2 %v457_v1  ;;  %v455_v5 = vld [vmem:[#allocation4 + $0x28] sm:$0xff]  ;;  %v446_v6 = vld [vmem:[#allocation2 + $0x20] sm:$0xff]  ;;  %v445_v8 = vld [vmem:[#allocation2 + $0x18] sm:$0xff]  ;;  %v70_v13 = vand.u32 127, %v69_v10 }
  0x10   :  { %v454_v7 = vld [vmem:[#allocation4 + $0x20] sm:$0xff]  ;;  %v453_v9 = vld [vmem:[#allocation4 + $0x18] sm:$0xff]  ;;  %v444_v11 = vld [vmem:[#allocation2 + $0x10] sm:$0xff] }
  0x11   :  { %v452_v12 = vld [vmem:[#allocation4 + $0x10] sm:$0xff]  ;;  %v67_v14 = vld [vmem:[%s612_s0] sm:$0xff]  ;;  %v68_v15 = vld [vmem:[%s612_s0 + $0x8] sm:$0xff]  ;;  %vm73_vm1 = vcmp.eq.s32.totalorder %v70_v13, 127 }
  0x12   :  { %146 = vmatpush.bf16.msra.mxu0 %v448_v2  ;;  %v443_v16 = vld [vmem:[#allocation2 + $0x8] sm:$0xff]  ;;  %vm71_vm0 = vcmp.eq.s32.totalorder %v70_v13, %v67_v14  ;;  %vm72_vm2 = vcmp.eq.s32.totalorder %v70_v13, %v68_v15  ;;  %v442_v18 = vld [vmem:[#allocation2] sm:$0xff]  ;;  %v465_v23 = vld [vmem:[#allocation6 + $0x38] sm:$0xff] }
  0x13   :  { %226 = vmatpush.bf16.msra.mxu1 %v456_v3  ;;  %242 = vmatpush.bf16.msra.mxu2 %v456_v3  ;;  %v451_v17 = vld [vmem:[#allocation4 + $0x8] sm:$0xff]  ;;  %v450_v19 = vld [vmem:[#allocation4] sm:$0xff]  ;;  %vm74_vm3 = vmor %vm71_vm0, %vm73_vm1 }
  0x14   :  { %v175_v20 = vld [vmem:[%s613_s1] sm:$0xff]  ;;  %vm75_vm4 = vmor %vm72_vm2, %vm73_vm1  ;;  %322 = vmatpush.bf16.msra.mxu3 %v465_v23  ;;  %v464_v24 = vld [vmem:[#allocation6 + $0x30] sm:$0xff] }
  0x15   :  { %v176_v21 = vpack.c.bf16 %v175_v20, %v175_v20  ;;  %vm376_vm5 = vmpackc.low %vm75_vm4, %vm74_vm3  ;;  %v463_v25 = vld [vmem:[#allocation6 + $0x28] sm:$0xff]  ;;  %v462_v26 = vld [vmem:[#allocation6 + $0x20] sm:$0xff] }
  0x16   :  { %147 = vmatpush.bf16.msra.mxu0 %v447_v4  ;;  %v461_v27 = vld [vmem:[#allocation6 + $0x18] sm:$0xff]  ;;  %v460_v34 = vld [vmem:[#allocation6 + $0x10] sm:$0xff]  ;;  %v459_v35 = vld [vmem:[#allocation6 + $0x8] sm:$0xff] }
  0x17   :  { %227 = vmatpush.bf16.msra.mxu1 %v455_v5  ;;  %243 = vmatpush.bf16.msra.mxu2 %v455_v5  ;;  %v458_v36 = vld [vmem:[#allocation6] sm:$0xff] }
  0x18   :  { %323 = vmatpush.bf16.msra.mxu3 %v464_v24 }
  0x1a   :  { %148 = vmatpush.bf16.msra.mxu0 %v446_v6 }
  0x1b   :  { %228 = vmatpush.bf16.msra.mxu1 %v454_v7  ;;  %244 = vmatpush.bf16.msra.mxu2 %v454_v7 }
  0x1c   :  { %324 = vmatpush.bf16.msra.mxu3 %v463_v25 }
  0x1e   :  { %149 = vmatpush.bf16.msra.mxu0 %v445_v8 }
  0x1f   :  { %229 = vmatpush.bf16.msra.mxu1 %v453_v9  ;;  %245 = vmatpush.bf16.msra.mxu2 %v453_v9 }
  0x20   :  { %325 = vmatpush.bf16.msra.mxu3 %v462_v26 }
  0x22   :  { %150 = vmatpush.bf16.msra.mxu0 %v444_v11 }
  0x23   :  { %230 = vmatpush.bf16.msra.mxu1 %v452_v12  ;;  %246 = vmatpush.bf16.msra.mxu2 %v452_v12 }
  0x24   :  { %326 = vmatpush.bf16.msra.mxu3 %v461_v27 }
  0x26   :  { %151 = vmatpush.bf16.msra.mxu0 %v443_v16 }
  0x27   :  { %231 = vmatpush.bf16.msra.mxu1 %v451_v17  ;;  %247 = vmatpush.bf16.msra.mxu2 %v451_v17 }
  0x28   :  { %327 = vmatpush.bf16.msra.mxu3 %v460_v34 }
  0x2a   :  { %152 = vmatpush.bf16.msra.mxu0 %v442_v18 }
  0x2b   :  { %232 = vmatpush.bf16.msra.mxu1 %v450_v19  ;;  %248 = vmatpush.bf16.msra.mxu2 %v450_v19 }
  0x2c   :  { %328 = vmatpush.bf16.msra.mxu3 %v459_v35 }
  0x2d   :  { %377 = vmatmul.msk.bf16.vlgmr.msra.gmra.mxu0 %vm376_vm5, %v557_v22 }
  0x2e   :  { %233 = vmatmul.bf16.vlgmr.msra.gmra.mxu1 %v176_v21 }
  0x30   :  { %329 = vmatpush.bf16.msra.mxu3 %v458_v36 }
  0xaa   :  { %v154_v28 = vpop.f32.mrf.mxu0 }
  0xab   :  { %v234_v29 = vpop.f32.mrf.mxu1 }
  0xac   :  { %v238_v30 = vadd.f32 %v234_v29, %v154_v28 }
  0xae   :  { %472 = vtanh.f32 %v238_v30 }
  0xb2   :  { %v156_v37 = vpop.f32.mrf.mxu0 }
  0xb3   :  { %v236_v31 = vpop.f32.mrf.mxu1 }
  0xb4   :  { %v473_v32 = vpop.eup %472 }
  0xb5   :  { %v240_v33 = vpack.c.bf16 %v473_v32, %v473_v32 }
  0xb7   :  { %249 = vmatmul.bf16.vlgmr.msra.gmra.mxu2 %v240_v33 }
 0x13a   :  { %v250_v38 = vpop.f32.mrf.mxu2 }
 0x13b   :  { %v254_v39 = vadd.f32 %v250_v38, %v156_v37 }
 0x13d   :  { %474 = vtanh.f32 %v254_v39 }
 0x142   :  { %v252_v40 = vpop.f32.mrf.mxu2 }
 0x143   :  { %v475_v41 = vpop.eup %474 }
 0x144   :  { %v256_v42 = vsel %vm73_vm1, 1.0, %v475_v41 }
 0x145   :  { %v257_v43 = vpack.c.bf16 %v256_v42, %v256_v42 }
 0x147   :  { %330 = vmatmul.bf16.vlgmr.msra.gmra.mxu3 %v257_v43 }
 0x1ca   :  { %v331_v44 = vpop.f32.mrf.mxu3 }
 0x1cb   :  { %335 = vst [vmem:[%s617_s5] sm:$0xff] %v331_v44 }
 0x1d2   :  { %v333_v45 = vpop.f32.mrf.mxu3 }
 0x1d3   :  { %340 = vsyncpa [#allocation3], 1 }
 0x1d4   :  { %341 = vsyncpa [#allocation5], 1 }

</bundles_post_ra>
